<compile_context>
chip_gen: v6e
topology: v6e:2x2x1
jax: 0.10.0
libtpu: 0.0.40
codegen_flags: <defaults>
</compile_context>

<pallas_src>
import math
import numpy as np
import jax
import jax.numpy as jnp
from jax.experimental import pallas as pl
from jax.experimental.pallas import tpu as pltpu


# ---------------------------------------------------------------------------
# Deterministic wavelet filter banks (reconstruction lo/hi, as pywt provides).
# ---------------------------------------------------------------------------
_SQRT2_INV = 1.0 / math.sqrt(2.0)
WAVELETS = {
    "haar": {
        "rec_lo": [_SQRT2_INV, _SQRT2_INV],
        "rec_hi": [_SQRT2_INV, -_SQRT2_INV],
    },
}
# TODO(synk): other pywt wavelets (db2, bior*, ...) only need their
# rec_lo/rec_hi coefficients added here; the matrix code handles any even
# filter length, but longer filters are untested.


def build_dwt_matrices(wavename, input_height, input_width, dtype=np.float32):
    """Port of DWT_2D.get_matrix() (numpy, no torch/pywt)."""
    band_low = WAVELETS[wavename]["rec_lo"]
    band_high = WAVELETS[wavename]["rec_hi"]
    assert len(band_low) == len(band_high)
    band_length = len(band_low)
    assert band_length % 2 == 0
    band_length_half = band_length // 2

    L1 = max(input_height, input_width)
    L = L1 // 2
    matrix_h = np.zeros((L, L1 + band_length - 2), dtype=np.float64)
    matrix_g = np.zeros((L1 - L, L1 + band_length - 2), dtype=np.float64)
    end = None if band_length_half == 1 else -band_length_half + 1

    index = 0
    for i in range(L):
        for j in range(band_length):
            matrix_h[i, index + j] = band_low[j]
        index += 2
    matrix_h_0 = matrix_h[0:input_height // 2, 0:input_height + band_length - 2]
    matrix_h_1 = matrix_h[0:input_width // 2, 0:input_width + band_length - 2]

    index = 0
    for i in range(L1 - L):
        for j in range(band_length):
            matrix_g[i, index + j] = band_high[j]
        index += 2
    matrix_g_0 = matrix_g[0:input_height - input_height // 2,
                          0:input_height + band_length - 2]
    matrix_g_1 = matrix_g[0:input_width - input_width // 2,
                          0:input_width + band_length - 2]

    matrix_h_0 = matrix_h_0[:, band_length_half - 1:end]
    matrix_h_1 = np.transpose(matrix_h_1[:, band_length_half - 1:end])
    matrix_g_0 = matrix_g_0[:, band_length_half - 1:end]
    matrix_g_1 = np.transpose(matrix_g_1[:, band_length_half - 1:end])

    # matrix_low_0: (H/2, H), matrix_low_1: (W, W/2),
    # matrix_high_0: (H - H/2, H), matrix_high_1: (W, W - W/2)
    return (matrix_h_0.astype(dtype), matrix_h_1.astype(dtype),
            matrix_g_0.astype(dtype), matrix_g_1.astype(dtype))


# ---------------------------------------------------------------------------
# Kernels
# ---------------------------------------------------------------------------
def _dwt2d_kron_kernel(x_ref, k_ref, ll_ref, lh_ref, hl_ref, hh_ref):
    """Small-image path: one lane-dense matmul of flattened images against the
    precomputed (H*W, H*W) Kronecker transform (band-major output columns)."""
    m = ll_ref.shape[-1]                                   # H2 * W2
    y = jnp.dot(x_ref[...], k_ref[...], preferred_element_type=jnp.float32)
    y = y.astype(ll_ref.dtype)
    ll_ref[...] = y[:, 0 * m:1 * m]
    lh_ref[...] = y[:, 1 * m:2 * m]
    hl_ref[...] = y[:, 2 * m:3 * m]
    hh_ref[...] = y[:, 3 * m:4 * m]


def _dwt2d_factored_kernel(x_ref, a0_ref, a1_ref, ll_ref, lh_ref, hl_ref, hh_ref):
    """Large-image path: Y_b = A0 @ X_b @ A1 with the column transform folded
    over the batch (single MXU matmul) and the row transform as one batched
    contraction (no per-image Python loop)."""
    tb, h, w = x_ref.shape
    h2, w2 = ll_ref.shape[1], ll_ref.shape[2]
    x = x_ref[...]
    a1 = a1_ref[...]                                       # (W, W) = [L1 | H1]
    a0 = a0_ref[...]                                       # (H, H) = [L0 ; H0]

    # Column transform folded along the MXU M dim: (tb*H, W) @ (W, W).
    # (Zero-cost relayout when H is a multiple of the sublane packing.)
    v = jnp.dot(x.reshape(tb * h, w), a1,
                preferred_element_type=jnp.float32).reshape(tb, h, w)
    v = v.astype(x.dtype)

    # Row transform as a single batched dot (A0 stationary across the batch).
    a0b = jnp.broadcast_to(a0, (tb, h, h))
    y = jnp.einsum("bij,bjw->biw", a0b, v,
                   preferred_element_type=jnp.float32).astype(ll_ref.dtype)

    ll_ref[...] = y[:, :h2, :w2]
    lh_ref[...] = y[:, h2:, :w2]
    hl_ref[...] = y[:, :h2, w2:]
    hh_ref[...] = y[:, h2:, w2:]


# ---------------------------------------------------------------------------
# Sizing helpers
# ---------------------------------------------------------------------------
def _round_up(x, m):
    return -(-x // m) * m


def _vmem_limit_and_budget():
    """Generation-aware scoped-VMEM limit and per-step working-set budget."""
    try:
        cap = int(pltpu.get_tpu_info().vmem_capacity_bytes)
    except Exception:
        cap = 64 * 1024 * 1024                     # conservative (v7x per-TC VMEM)
    limit = min((cap * 3) // 4, 96 * 1024 * 1024)  # ~48 MiB on v7x, 96 MiB on v5e/v6e
    budget = limit // 2                            # leave pipelining headroom
    return limit, budget


def _choose_tb(avail_bytes, per_image_bytes, B, multiple):
    """Images per grid step: biggest block within the VMEM budget, aligned to
    `multiple` (sublane packing for 2D blocks), and capped so the grid keeps
    >= 4 steps when there is enough work (>= 2 pipelined steps per v7x TC)."""
    tb = max(int(avail_bytes // max(per_image_bytes, 1)), 1)
    if multiple > 1:
        tb = max((tb // multiple) * multiple, multiple)
    if B >= 4 * max(multiple, 2):
        cap = max(((-(-B // 4)) // multiple) * multiple, multiple)
        tb = min(tb, cap)
    tb = min(tb, _round_up(B, multiple))
    return max(tb, multiple)


# ---------------------------------------------------------------------------
# Wrapper
# ---------------------------------------------------------------------------
def dwt_2d(x, matrix_low_0, matrix_low_1, matrix_high_0, matrix_high_1):
    """x: (N, C, H, W). Returns (lfc, hfc_lh, hfc_hl, hfc_hh), each (N, C, H/2, W/2)."""
    N, C, H, W = x.shape
    # TODO(synk): odd H/W produce ragged high-band shapes; only even dims supported.
    assert H % 2 == 0 and W % 2 == 0, "DWT_2D Pallas kernel requires even H, W"
    H2, W2 = H // 2, W // 2
    B = N * C
    dtype = x.dtype
    itemsize = x.dtype.itemsize
    limit, budget = _vmem_limit_and_budget()
    cparams = pltpu.CompilerParams(dimension_semantics=("parallel",),
                                   vmem_limit_bytes=limit)

    # Small images: a (tb, H, W) block occupies only W of 128 lanes (masked
    # stores, <=12% MXU fill).  Flatten each image to a lane-dense H*W row and
    # apply the whole separable transform as one matmul against the Kronecker
    # matrix with band-major columns [LL | LH | HL | HH].
    use_kron = (W < 128) and (H * W <= 1024)

    if use_kron:
        HW, m = H * W, H2 * W2
        l0t, h0t = matrix_low_0.T, matrix_high_0.T           # (H, H2), (H, H2)
        kmat = jnp.concatenate(
            [jnp.kron(l0t, matrix_low_1),                    # LL columns
             jnp.kron(h0t, matrix_low_1),                    # LH columns
             jnp.kron(l0t, matrix_high_1),                   # HL columns
             jnp.kron(h0t, matrix_high_1)],                  # HH columns
            axis=1).astype(dtype)                            # (HW, HW)

        fixed = 2 * HW * HW * itemsize                       # double-buffered K
        per_img = HW * (4 * itemsize + 4)                    # in + outs (x2 buf) + f32 result
        tb = _choose_tb(budget - fixed, per_img, B, multiple=8)
        num_steps = -(-B // tb)
        Bp = num_steps * tb

        x_flat = x.reshape(B, HW)
        if Bp != B:
            x_flat = jnp.pad(x_flat, ((0, Bp - B), (0, 0)))

        grid_spec = pltpu.PrefetchScalarGridSpec(
            num_scalar_prefetch=0,
            grid=(num_steps,),
            in_specs=[
                pl.BlockSpec((tb, HW), lambda i: (i, 0)),
                pl.BlockSpec((HW, HW), lambda i: (0, 0)),
            ],
            out_specs=[pl.BlockSpec((tb, m), lambda i: (i, 0))
                       for _ in range(4)],
        )
        outs = pl.pallas_call(
            _dwt2d_kron_kernel,
            out_shape=[jax.ShapeDtypeStruct((Bp, m), dtype) for _ in range(4)],
            grid_spec=grid_spec,
            compiler_params=cparams,
        )(x_flat, kmat)
    else:
        a0 = jnp.concatenate([matrix_low_0, matrix_high_0], axis=0).astype(dtype)  # (H, H)
        a1 = jnp.concatenate([matrix_low_1, matrix_high_1], axis=1).astype(dtype)  # (W, W)

        fixed = 2 * (H * H + W * W) * itemsize               # double-buffered A0, A1
        # in + outs (x2 buf) + f32 v + f32 y + broadcast A0, per image
        per_img = H * W * (4 * itemsize + 8) + H * H * itemsize
        tb = _choose_tb(budget - fixed, per_img, B, multiple=1)
        num_steps = -(-B // tb)
        Bp = num_steps * tb

        x3 = x.reshape(B, H, W)
        if Bp != B:
            x3 = jnp.pad(x3, ((0, Bp - B), (0, 0), (0, 0)))

        grid_spec = pltpu.PrefetchScalarGridSpec(
            num_scalar_prefetch=0,
            grid=(num_steps,),
            in_specs=[
                pl.BlockSpec((tb, H, W), lambda i: (i, 0, 0)),
                pl.BlockSpec((H, H), lambda i: (0, 0)),
                pl.BlockSpec((W, W), lambda i: (0, 0)),
            ],
            out_specs=[pl.BlockSpec((tb, H2, W2), lambda i: (i, 0, 0))
                       for _ in range(4)],
        )
        outs = pl.pallas_call(
            _dwt2d_factored_kernel,
            out_shape=[jax.ShapeDtypeStruct((Bp, H2, W2), dtype) for _ in range(4)],
            grid_spec=grid_spec,
            compiler_params=cparams,
        )(x3, a0, a1)

    ll, lh, hl, hh = (o[:B].reshape(N, C, H2, W2) for o in outs)
    return ll, lh, hl, hh


# ---------------------------------------------------------------------------
# Reference (plain JAX) for correctness check.
# ---------------------------------------------------------------------------
def dwt_2d_ref(x, ml0, ml1, mh0, mh1):
    L = jnp.einsum("pq,ncqw->ncpw", ml0, x)
    Hh = jnp.einsum("pq,ncqw->ncpw", mh0, x)
    LL = jnp.einsum("ncpw,wr->ncpr", L, ml1)
    LH = jnp.einsum("ncpw,wr->ncpr", Hh, ml1)
    HL = jnp.einsum("ncpw,wr->ncpr", L, mh1)
    HH = jnp.einsum("ncpw,wr->ncpr", Hh, mh1)
    return LL, LH, HL, HH


if __name__ == "__main__":
    wavename = "haar"
    key = jax.random.PRNGKey(0)

    # --- Small-image shape (exercises the lane-dense Kronecker path). ------
    N, C, H, W = 2, 4, 16, 16
    x = jax.random.normal(key, (N, C, H, W), dtype=jnp.float32)
    mats = tuple(jnp.asarray(m) for m in build_dwt_matrices(wavename, H, W))
    outs = jax.block_until_ready(dwt_2d(x, *mats))
    refs = dwt_2d_ref(x, *mats)
    for o, r in zip(outs, refs):
        assert o.shape == (N, C, H // 2, W // 2)
        np.testing.assert_allclose(np.asarray(o), np.asarray(r),
                                   rtol=1e-5, atol=1e-5)

    # --- Larger shape (exercises the factored batched-matmul path). --------
    Nb, Cb, Hb, Wb = 1, 3, 128, 128
    xb = jax.random.normal(jax.random.fold_in(key, 1), (Nb, Cb, Hb, Wb),
                           dtype=jnp.float32)
    matsb = tuple(jnp.asarray(m) for m in build_dwt_matrices(wavename, Hb, Wb))
    outsb = jax.block_until_ready(dwt_2d(xb, *matsb))
    refsb = dwt_2d_ref(xb, *matsb)
    for o, r in zip(outsb, refsb):
        assert o.shape == (Nb, Cb, Hb // 2, Wb // 2)
        np.testing.assert_allclose(np.asarray(o), np.asarray(r),
                                   rtol=1e-4, atol=1e-4)

    print("KERNEL_OK")
</pallas_src>

<mosaic_0001>
module attributes {stable_mosaic.version = 11 : i64} {
  func.func @_dwt2d_kron_kernel(%arg0: i32, %arg1: memref<8x256xf32, #tpu.memory_space<vmem>>, %arg2: memref<256x256xf32, #tpu.memory_space<vmem>>, %arg3: memref<8x64xf32, #tpu.memory_space<vmem>>, %arg4: memref<8x64xf32, #tpu.memory_space<vmem>>, %arg5: memref<8x64xf32, #tpu.memory_space<vmem>>, %arg6: memref<8x64xf32, #tpu.memory_space<vmem>>) attributes {dimension_semantics = [#tpu.dimension_semantics<parallel>], iteration_bounds = array<i64: 1>, scalar_prefetch = 0 : i64, scratch_operands = 0 : i64, tpu.core_type = #tpu.core_type<tc>, window_params = [{transform_indices = @transform_0, window_bounds = array<i64: 8, 256>}, {pipeline_mode = #tpu.pipeline_mode<synchronous>, transform_indices = @transform_1, window_bounds = array<i64: 256, 256>}, {transform_indices = @transform_2, window_bounds = array<i64: 8, 64>}, {transform_indices = @transform_3, window_bounds = array<i64: 8, 64>}, {transform_indices = @transform_4, window_bounds = array<i64: 8, 64>}, {transform_indices = @transform_5, window_bounds = array<i64: 8, 64>}]} {
    %c0 = arith.constant 0 : index
    %c0_0 = arith.constant 0 : index
    %0 = vector.load %arg1[%c0, %c0_0] : memref<8x256xf32, #tpu.memory_space<vmem>>, vector<8x256xf32>
    %c0_1 = arith.constant 0 : index
    %c0_2 = arith.constant 0 : index
    %1 = vector.load %arg2[%c0_1, %c0_2] : memref<256x256xf32, #tpu.memory_space<vmem>>, vector<256x256xf32>
    %cst = arith.constant dense<0.000000e+00> : vector<8x256xf32>
    %2 = tpu.matmul %0, %1, %cst {dimension_numbers = #tpu.dot_dimension_numbers<[1], [0], [0], [1], [0, 0, 1, 1], [], []>} : vector<8x256xf32>, vector<256x256xf32>, vector<8x256xf32> -> vector<8x256xf32>
    %3 = vector.extract_strided_slice %2 {offsets = [0, 0], sizes = [8, 64], strides = [1, 1]} : vector<8x256xf32> to vector<8x64xf32>
    %c0_3 = arith.constant 0 : index
    %c0_4 = arith.constant 0 : index
    %4 = vector.load %arg3[%c0_3, %c0_4] : memref<8x64xf32, #tpu.memory_space<vmem>>, vector<8x64xf32>
    tpu.vector_store %arg3[%c0_3, %c0_4], %3 {strides = array<i32>} : memref<8x64xf32, #tpu.memory_space<vmem>>, vector<8x64xf32>,
    %5 = vector.extract_strided_slice %2 {offsets = [0, 64], sizes = [8, 64], strides = [1, 1]} : vector<8x256xf32> to vector<8x64xf32>
    %c0_5 = arith.constant 0 : index
    %c0_6 = arith.constant 0 : index
    %6 = vector.load %arg4[%c0_5, %c0_6] : memref<8x64xf32, #tpu.memory_space<vmem>>, vector<8x64xf32>
    tpu.vector_store %arg4[%c0_5, %c0_6], %5 {strides = array<i32>} : memref<8x64xf32, #tpu.memory_space<vmem>>, vector<8x64xf32>,
    %7 = vector.extract_strided_slice %2 {offsets = [0, 128], sizes = [8, 64], strides = [1, 1]} : vector<8x256xf32> to vector<8x64xf32>
    %c0_7 = arith.constant 0 : index
    %c0_8 = arith.constant 0 : index
    %8 = vector.load %arg5[%c0_7, %c0_8] : memref<8x64xf32, #tpu.memory_space<vmem>>, vector<8x64xf32>
    tpu.vector_store %arg5[%c0_7, %c0_8], %7 {strides = array<i32>} : memref<8x64xf32, #tpu.memory_space<vmem>>, vector<8x64xf32>,
    %9 = vector.extract_strided_slice %2 {offsets = [0, 192], sizes = [8, 64], strides = [1, 1]} : vector<8x256xf32> to vector<8x64xf32>
    %c0_9 = arith.constant 0 : index
    %c0_10 = arith.constant 0 : index
    %10 = vector.load %arg6[%c0_9, %c0_10] : memref<8x64xf32, #tpu.memory_space<vmem>>, vector<8x64xf32>
    tpu.vector_store %arg6[%c0_9, %c0_10], %9 {strides = array<i32>} : memref<8x64xf32, #tpu.memory_space<vmem>>, vector<8x64xf32>,
    return
  }
  func.func @transform_0(%arg0: i32) -> (i32, i32) {
    %c0_i32 = arith.constant 0 : i32
    %c0_i32_0 = arith.constant 0 : i32
    return %arg0, %c0_i32 : i32, i32
  }
  func.func @transform_1(%arg0: i32) -> (i32, i32) {
    %c0_i32 = arith.constant 0 : i32
    %c0_i32_0 = arith.constant 0 : i32
    %c0_i32_1 = arith.constant 0 : i32
    return %c0_i32, %c0_i32_0 : i32, i32
  }
  func.func @transform_2(%arg0: i32) -> (i32, i32) {
    %c0_i32 = arith.constant 0 : i32
    %c0_i32_0 = arith.constant 0 : i32
    return %arg0, %c0_i32 : i32, i32
  }
  func.func @transform_3(%arg0: i32) -> (i32, i32) {
    %c0_i32 = arith.constant 0 : i32
    %c0_i32_0 = arith.constant 0 : i32
    return %arg0, %c0_i32 : i32, i32
  }
  func.func @transform_4(%arg0: i32) -> (i32, i32) {
    %c0_i32 = arith.constant 0 : i32
    %c0_i32_0 = arith.constant 0 : i32
    return %arg0, %c0_i32 : i32, i32
  }
  func.func @transform_5(%arg0: i32) -> (i32, i32) {
    %c0_i32 = arith.constant 0 : i32
    %c0_i32_0 = arith.constant 0 : i32
    return %arg0, %c0_i32 : i32, i32
  }
}

</mosaic_0001>

<bundles_post_ra>
// kernel: tpu_custom_call.1
= control target key start
LH: loop header
LB: loop body
LE: loop exit
PB: predicated region body
PF: predicated region fallthrough
CT: control target
= control target key end

     0   :  { %11 = vsyncpa [#allocation3], 0  ;;  %s451_s0 = inlined_call_operand.hbm [shape: f32[8,256], index: 0, kind: input, shape index: {}]   ;;  %s452_s1 = inlined_call_operand.hbm [shape: f32[256,256], index: 1, kind: input, shape index: {}]   ;;  %s453_s2 = inlined_call_operand.hbm [shape: f32[8,64], index: 2, kind: output, shape index: {0}]   ;;  %s454_s3 = inlined_call_operand.hbm [shape: f32[8,64], index: 3, kind: output, shape index: {1}]   ;;  %s455_s4 = inlined_call_operand.hbm [shape: f32[8,64], index: 4, kind: output, shape index: {2}]   ;;  %s456_s5 = inlined_call_operand.hbm [shape: f32[8,64], index: 5, kind: output, shape index: {3}]  }
   0x1   :  { %12 = vsyncpa [#allocation6], 0 }
   0x2   :  { %13 = vsyncpa [#allocation4], 0 }
   0x3   :  { %14 = vsyncpa [#allocation9], 0 }
   0x4   :  { %15 = vsyncpa [#allocation12], 0  ;;  %s390_s18 = smov [#allocation2]   ;;  %s391_s20 = smov [#allocation5]  }
   0x5   :  { %s22_s19 = sshll.u32 %s390_s18, 4  ;;  %s31_s21 = sshll.u32 %s391_s20, 4  ;;  %s23_s19 = int_to_ptr.vmem [resolvable:$true] %s22_s19  ;;  %s32_s21 = int_to_ptr.vmem [resolvable:$true] %s31_s21 }
   0x6   :  { %s268_s22 = scalar_lea.vmem %s23_s19, 256  ;;  %p273_p1 = scmp.lt.s32.totalorder %s23_s19, %s23_s19 }
   0x7   :  { %p269_p0 = scmp.ne.s32.totalorder %s23_s19, %s268_s22  ;;  %p274_p2 = scmp.lt.s32.totalorder %s268_s22, %s268_s22 }
   0x9   :  { %p275_p3 = por %p274_p2, %p273_p1 }
   0xb   :  { %p276_p4 = pnand %p275_p3, %p269_p0 }
   0xd   :  { %279 = shalt.err (!%p276_p4)
}
   0xe   :  { %25 = dma.hbm_to_vmem [thread:$0]  %s451_s0, 256, %s23_s19, [#allocation3]  }
   0xf   :  { %s288_s25 = scalar_lea.vmem %s32_s21, 8192  ;;  %p293_p6 = scmp.lt.s32.totalorder %s32_s21, %s32_s21 }
  0x10   :  { %p289_p5 = scmp.ne.s32.totalorder %s32_s21, %s288_s25  ;;  %p294_p7 = scmp.lt.s32.totalorder %s288_s25, %s288_s25 }
  0x12   :  { %p295_p8 = por %p294_p7, %p293_p6 }
  0x14   :  { %p296_p9 = pnand %p295_p8, %p289_p5 }
  0x16   :  { %299 = shalt.err (!%p296_p9)
}
  0x17   :  { %s392_s26 = smov 256   ;;  %s393_s27 = smov 16  }
  0x18   :  { %37 = dma.hbm_to_vmem [thread:$0]  %s452_s1, 8192, %s32_s21, [#allocation6], %s392_s26, %s392_s26, %s393_s27  }
  0x19   :  { %380 = dma.done.wait [#allocation3], 256  }
  0x1a   :  { %381 = vsyncadd [#allocation3], 4294967040 }
  0x1b   :  { %382 = dma.done.wait [#allocation6], 8192  }
  0x1c   :  { %383 = vsyncadd [#allocation6], 4294959104  ;;  %v77_v0 = vld [vmem:[#allocation5 + $0xf8] sm:$0xff]  ;;  %v76_v1 = vld [vmem:[#allocation5 + $0xf0] sm:$0xff]  ;;  %s394_s0 = smov [#allocation7]   ;;  %vm181_vm0 = vcmask 523264  }
  0x1d   :  { %v75_v2 = vld [vmem:[#allocation5 + $0xe8] sm:$0xff]  ;;  %110 = vmatprep.subr.mxu0 %v77_v0  ;;  %v74_v3 = vld [vmem:[#allocation5 + $0xe0] sm:$0xff]  ;;  %v73_v4 = vld [vmem:[#allocation5 + $0xd8] sm:$0xff]  ;;  %s200_s1 = sshll.u32 %s394_s0, 4  ;;  %s395_s30 = smov 64   ;;  %s201_s1 = int_to_ptr.vmem [resolvable:$true] %s200_s1 }
  0x1e   :  { %111 = vmatpush1.msra.mxu0 %v76_v1  ;;  %v72_v5 = vld [vmem:[#allocation5 + $0xd0] sm:$0xff]  ;;  %v71_v6 = vld [vmem:[#allocation5 + $0xc8] sm:$0xff]  ;;  %v70_v7 = vld [vmem:[#allocation5 + $0xc0] sm:$0xff]  ;;  %s300_s6 = scalar_lea.vmem %s201_s1, 128  ;;  %p305_p11 = scmp.lt.s32.totalorder %s201_s1, %s201_s1 }
  0x1f   :  { %112 = vmatprep.subr.mxu0 %v75_v2  ;;  %v69_v8 = vld [vmem:[#allocation5 + $0xb8] sm:$0xff]  ;;  %v68_v9 = vld [vmem:[#allocation5 + $0xb0] sm:$0xff]  ;;  %v67_v10 = vld [vmem:[#allocation5 + $0xa8] sm:$0xff]  ;;  %p301_p10 = scmp.ne.s32.totalorder %s201_s1, %s300_s6  ;;  %p306_p12 = scmp.lt.s32.totalorder %s300_s6, %s300_s6 }
  0x20   :  { %113 = vmatpush1.msra.mxu0 %v74_v3  ;;  %v66_v11 = vld [vmem:[#allocation5 + $0xa0] sm:$0xff]  ;;  %v65_v12 = vld [vmem:[#allocation5 + $0x98] sm:$0xff]  ;;  %v64_v13 = vld [vmem:[#allocation5 + $0x90] sm:$0xff] }
  0x21   :  { %114 = vmatprep.subr.mxu0 %v73_v4  ;;  %v63_v14 = vld [vmem:[#allocation5 + $0x88] sm:$0xff]  ;;  %v62_v15 = vld [vmem:[#allocation5 + $0x80] sm:$0xff]  ;;  %v61_v16 = vld [vmem:[#allocation5 + $0x78] sm:$0xff]  ;;  %p307_p13 = por %p306_p12, %p305_p11 }
  0x22   :  { %115 = vmatpush1.msra.mxu0 %v72_v5  ;;  %v60_v17 = vld [vmem:[#allocation5 + $0x70] sm:$0xff]  ;;  %v59_v18 = vld [vmem:[#allocation5 + $0x68] sm:$0xff]  ;;  %v58_v19 = vld [vmem:[#allocation5 + $0x60] sm:$0xff] }
  0x23   :  { %116 = vmatprep.subr.mxu0 %v71_v6  ;;  %v57_v20 = vld [vmem:[#allocation5 + $0x58] sm:$0xff]  ;;  %v56_v21 = vld [vmem:[#allocation5 + $0x50] sm:$0xff]  ;;  %v55_v22 = vld [vmem:[#allocation5 + $0x48] sm:$0xff]  ;;  %p308_p0 = pnand %p307_p13, %p301_p10 }
  0x24   :  { %117 = vmatpush1.msra.mxu0 %v70_v7  ;;  %v54_v23 = vld [vmem:[#allocation5 + $0x40] sm:$0xff]  ;;  %v45_v24 = vld [vmem:[#allocation2 + $0x8] sm:$0xff]  ;;  %v52_v26 = vld [vmem:[#allocation5 + $0x30] sm:$0xff] }
  0x25   :  { %118 = vmatprep.subr.mxu0 %v69_v8  ;;  %v53_v25 = vld [vmem:[#allocation5 + $0x38] sm:$0xff]  ;;  %174 = vmatprep.mubr.f32.mxu0 %v45_v24  ;;  %v51_v27 = vld [vmem:[#allocation5 + $0x28] sm:$0xff]  ;;  %v50_v28 = vld [vmem:[#allocation5 + $0x20] sm:$0xff] }
  0x26   :  { %119 = vmatpush1.msra.mxu0 %v68_v9  ;;  %v49_v29 = vld [vmem:[#allocation5 + $0x18] sm:$0xff]  ;;  %v48_v30 = vld [vmem:[#allocation5 + $0x10] sm:$0xff]  ;;  %v47_v31 = vld [vmem:[#allocation5 + $0x8] sm:$0xff] }
  0x27   :  { %120 = vmatprep.subr.mxu0 %v67_v10  ;;  %v46_v32 = vld [vmem:[#allocation5] sm:$0xff]  ;;  %v109_v33 = vld [vmem:[#allocation5 + $0x1f8] sm:$0xff]  ;;  %v108_v34 = vld [vmem:[#allocation5 + $0x1f0] sm:$0xff] }
  0x28   :  { %121 = vmatpush1.msra.mxu0 %v66_v11  ;;  %v107_v35 = vld [vmem:[#allocation5 + $0x1e8] sm:$0xff]  ;;  %v106_v36 = vld [vmem:[#allocation5 + $0x1e0] sm:$0xff]  ;;  %v105_v37 = vld [vmem:[#allocation5 + $0x1d8] sm:$0xff] }
  0x29   :  { %122 = vmatprep.subr.mxu0 %v65_v12  ;;  %v104_v38 = vld [vmem:[#allocation5 + $0x1d0] sm:$0xff]  ;;  %v103_v39 = vld [vmem:[#allocation5 + $0x1c8] sm:$0xff]  ;;  %v102_v40 = vld [vmem:[#allocation5 + $0x1c0] sm:$0xff] }
  0x2a   :  { %123 = vmatpush1.msra.mxu0 %v64_v13  ;;  %v101_v41 = vld [vmem:[#allocation5 + $0x1b8] sm:$0xff]  ;;  %v100_v42 = vld [vmem:[#allocation5 + $0x1b0] sm:$0xff]  ;;  %v99_v43 = vld [vmem:[#allocation5 + $0x1a8] sm:$0xff] }
  0x2b   :  { %124 = vmatprep.subr.mxu0 %v63_v14  ;;  %v98_v44 = vld [vmem:[#allocation5 + $0x1a0] sm:$0xff]  ;;  %v97_v45 = vld [vmem:[#allocation5 + $0x198] sm:$0xff]  ;;  %v96_v46 = vld [vmem:[#allocation5 + $0x190] sm:$0xff] }
  0x2c   :  { %125 = vmatpush1.msra.mxu0 %v62_v15  ;;  %v95_v47 = vld [vmem:[#allocation5 + $0x188] sm:$0xff]  ;;  %v94_v48 = vld [vmem:[#allocation5 + $0x180] sm:$0xff]  ;;  %v93_v49 = vld [vmem:[#allocation5 + $0x178] sm:$0xff] }
  0x2d   :  { %126 = vmatprep.subr.mxu0 %v61_v16  ;;  %v92_v50 = vld [vmem:[#allocation5 + $0x170] sm:$0xff]  ;;  %v91_v51 = vld [vmem:[#allocation5 + $0x168] sm:$0xff]  ;;  %v90_v52 = vld [vmem:[#allocation5 + $0x160] sm:$0xff] }
  0x2e   :  { %127 = vmatpush1.msra.mxu0 %v60_v17  ;;  %v89_v53 = vld [vmem:[#allocation5 + $0x158] sm:$0xff]  ;;  %v88_v54 = vld [vmem:[#allocation5 + $0x150] sm:$0xff]  ;;  %v87_v55 = vld [vmem:[#allocation5 + $0x148] sm:$0xff] }
  0x2f   :  { %128 = vmatprep.subr.mxu0 %v59_v18  ;;  %v86_v56 = vld [vmem:[#allocation5 + $0x140] sm:$0xff]  ;;  %v85_v57 = vld [vmem:[#allocation5 + $0x138] sm:$0xff]  ;;  %v84_v58 = vld [vmem:[#allocation5 + $0x130] sm:$0xff] }
  0x30   :  { %129 = vmatpush1.msra.mxu0 %v58_v19  ;;  %v83_v59 = vld [vmem:[#allocation5 + $0x128] sm:$0xff]  ;;  %v82_v60 = vld [vmem:[#allocation5 + $0x120] sm:$0xff]  ;;  %v81_v61 = vld [vmem:[#allocation5 + $0x118] sm:$0xff] }
  0x31   :  { %130 = vmatprep.subr.mxu0 %v57_v20  ;;  %v80_v62 = vld [vmem:[#allocation5 + $0x110] sm:$0xff]  ;;  %v79_v63 = vld [vmem:[#allocation5 + $0x108] sm:$0xff]  ;;  %v78_v0 = vld [vmem:[#allocation5 + $0x100] sm:$0xff] }
  0x32   :  { %131 = vmatpush1.msra.mxu0 %v56_v21  ;;  %v44_v1 = vld [vmem:[#allocation2] sm:$0xff] }
  0x33   :  { %132 = vmatprep.subr.mxu0 %v55_v22 }
  0x34   :  { %133 = vmatpush1.msra.mxu0 %v54_v23 }
  0x35   :  { %134 = vmatprep.subr.mxu0 %v53_v25 }
  0x36   :  { %135 = vmatpush1.msra.mxu0 %v52_v26 }
  0x37   :  { %136 = vmatprep.subr.mxu0 %v51_v27 }
  0x38   :  { %137 = vmatpush1.msra.mxu0 %v50_v28 }
  0x39   :  { %138 = vmatprep.subr.mxu0 %v49_v29 }
  0x3a   :  { %139 = vmatpush1.msra.mxu0 %v48_v30 }
  0x3b   :  { %140 = vmatprep.subr.mxu0 %v47_v31 }
  0x3c   :  { %141 = vmatpush1.msra.mxu0 %v46_v32 }
  0x3d   :  { %142 = vmatprep.subr.mxu0 %v109_v33 }
  0x3e   :  { %143 = vmatpush2.msra.mxu0 %v108_v34 }
  0x3f   :  { %144 = vmatprep.subr.mxu0 %v107_v35 }
  0x40   :  { %145 = vmatpush2.msra.mxu0 %v106_v36 }
  0x41   :  { %146 = vmatprep.subr.mxu0 %v105_v37 }
  0x42   :  { %147 = vmatpush2.msra.mxu0 %v104_v38 }
  0x43   :  { %148 = vmatprep.subr.mxu0 %v103_v39 }
  0x44   :  { %149 = vmatpush2.msra.mxu0 %v102_v40 }
  0x45   :  { %150 = vmatprep.subr.mxu0 %v101_v41 }
  0x46   :  { %151 = vmatpush2.msra.mxu0 %v100_v42 }
  0x47   :  { %152 = vmatprep.subr.mxu0 %v99_v43 }
  0x48   :  { %153 = vmatpush2.msra.mxu0 %v98_v44 }
  0x49   :  { %154 = vmatprep.subr.mxu0 %v97_v45 }
  0x4a   :  { %155 = vmatpush2.msra.mxu0 %v96_v46 }
  0x4b   :  { %156 = vmatprep.subr.mxu0 %v95_v47 }
  0x4c   :  { %157 = vmatpush2.msra.mxu0 %v94_v48 }
  0x4d   :  { %158 = vmatprep.subr.mxu0 %v93_v49 }
  0x4e   :  { %159 = vmatpush2.msra.mxu0 %v92_v50 }
  0x4f   :  { %160 = vmatprep.subr.mxu0 %v91_v51 }
  0x50   :  { %161 = vmatpush2.msra.mxu0 %v90_v52 }
  0x51   :  { %162 = vmatprep.subr.mxu0 %v89_v53 }
  0x52   :  { %163 = vmatpush2.msra.mxu0 %v88_v54 }
  0x53   :  { %164 = vmatprep.subr.mxu0 %v87_v55 }
  0x54   :  { %165 = vmatpush2.msra.mxu0 %v86_v56 }
  0x55   :  { %166 = vmatprep.subr.mxu0 %v85_v57 }
  0x56   :  { %167 = vmatpush2.msra.mxu0 %v84_v58 }
  0x57   :  { %168 = vmatprep.subr.mxu0 %v83_v59 }
  0x58   :  { %169 = vmatpush2.msra.mxu0 %v82_v60 }
  0x59   :  { %170 = vmatprep.subr.mxu0 %v81_v61 }
  0x5a   :  { %171 = vmatpush2.msra.mxu0 %v80_v62 }
  0x5b   :  { %172 = vmatprep.subr.mxu0 %v79_v63 }
  0x5c   :  { %173 = vmatpush2.msra.mxu0 %v78_v0 }
  0x5d   :  { %175 = vmatmul.mubr.f32.vlgmr.msra.gmra.mxu0 %v44_v1 }
 0x11d   :  { %v176_v2 = vpop.f32.mrf.mxu0 }
 0x11e   :  { %184 = vrot.lane.b32.xlu0 %v176_v2, %s395_s30  ;;  %182 = vst.msk [vmem:[#allocation7] sm:$0xff] %vm181_vm0, %v176_v2 }
 0x11f   :  { %v178_v3 = vpop.f32.mrf.mxu0 }
 0x120   :  { %311 = shalt.err (!%p308_p0)
}
 0x121   :  { %203 = dma.vmem_to_hbm [thread:$0]  %s201_s1, 128, %s453_s2, [#allocation4]   ;;  %188 = vst.msk [vmem:[#allocation10] sm:$0xff] %vm181_vm0, %v178_v3 }
 0x122   :  { %190 = vrot.lane.b32.xlu0 %v178_v3, %s395_s30  ;;  %s396_s9 = smov [#allocation8]   ;;  %s397_s11 = smov [#allocation10]  }
 0x123   :  { %s210_s10 = sshll.u32 %s396_s9, 4  ;;  %s220_s12 = sshll.u32 %s397_s11, 4  ;;  %s211_s10 = int_to_ptr.vmem [resolvable:$true] %s210_s10  ;;  %s221_s12 = int_to_ptr.vmem [resolvable:$true] %s220_s12 }
 0x124   :  { %s398_s13 = smov [#allocation11]   ;;  %s320_s15 = scalar_lea.vmem %s211_s10, 128 }
 0x125   :  { %s230_s14 = sshll.u32 %s398_s13, 4  ;;  %p321_p1 = scmp.ne.s32.totalorder %s211_s10, %s320_s15  ;;  %s231_s14 = int_to_ptr.vmem [resolvable:$true] %s230_s14 }
 0x126   :  { %p325_p2 = scmp.lt.s32.totalorder %s211_s10, %s211_s10  ;;  %p326_p3 = scmp.lt.s32.totalorder %s320_s15, %s320_s15 }
 0x128   :  { %p327_p4 = por %p326_p3, %p325_p2 }
 0x12a   :  { %p328_p5 = pnand %p327_p4, %p321_p1 }
 0x190   :  { %v185_v4 = vpop.permute.xlu0 %184 }
 0x191   :  { %187 = vst.msk [vmem:[#allocation8] sm:$0xff] %vm181_vm0, %v185_v4 }
 0x192   :  { %331 = shalt.err (!%p328_p5)
}
 0x193   :  { %213 = dma.vmem_to_hbm [thread:$0]  %s211_s10, 128, %s454_s3, [#allocation9]  }
 0x194   :  { %s340_s17 = scalar_lea.vmem %s221_s12, 128  ;;  %p345_p7 = scmp.lt.s32.totalorder %s221_s12, %s221_s12 }
 0x195   :  { %p341_p6 = scmp.ne.s32.totalorder %s221_s12, %s340_s17  ;;  %p346_p8 = scmp.lt.s32.totalorder %s340_s17, %s340_s17 }
 0x197   :  { %p347_p9 = por %p346_p8, %p345_p7 }
 0x199   :  { %p348_p10 = pnand %p347_p9, %p341_p6 }
 0x19b   :  { %351 = shalt.err (!%p348_p10)
}
 0x19c   :  { %223 = dma.vmem_to_hbm [thread:$0]  %s221_s12, 128, %s455_s4, [#allocation9]   ;;  %v191_v5 = vpop.permute.xlu0 %190 }
 0x19d   :  { %193 = vst.msk [vmem:[#allocation11] sm:$0xff] %vm181_vm0, %v191_v5  ;;  %s360_s20 = scalar_lea.vmem %s231_s14, 128  ;;  %p365_p12 = scmp.lt.s32.totalorder %s231_s14, %s231_s14 }
 0x19e   :  { %p361_p11 = scmp.ne.s32.totalorder %s231_s14, %s360_s20  ;;  %p366_p13 = scmp.lt.s32.totalorder %s360_s20, %s360_s20 }
 0x1a0   :  { %p367_p0 = por %p366_p13, %p365_p12 }
 0x1a2   :  { %p368_p1 = pnand %p367_p0, %p361_p11 }
 0x1a4   :  { %371 = shalt.err (!%p368_p1)
}
 0x1a5   :  { %233 = dma.vmem_to_hbm [thread:$0]  %s231_s14, 128, %s456_s5, [#allocation12]  }
 0x1a6   :  { %384 = dma.done.wait [#allocation4], 128  }
 0x1a7   :  { %385 = vsyncadd [#allocation4], 4294967168 }
 0x1a8   :  { %386 = dma.done.wait [#allocation9], 256  }
 0x1a9   :  { %387 = vsyncadd [#allocation9], 4294967040 }
 0x1aa   :  { %388 = dma.done.wait [#allocation12], 128  }
 0x1ab   :  { %389 = vsyncadd [#allocation12], 4294967168 }
 0x1ac   :  { %246 = vsyncpa [#allocation3], 1 }
 0x1ad   :  { %247 = vsyncpa [#allocation6], 1 }
 0x1ae   :  { %248 = vsyncpa [#allocation4], 1 }
 0x1af   :  { %249 = vsyncpa [#allocation9], 1 }
 0x1b0   :  { %250 = vsyncpa [#allocation12], 1 }

</bundles_post_ra>
